<compile_context>
chip_gen: v5e
topology: v5e:2x2
jax: 0.10.0
libtpu: 0.0.40
codegen_flags: <defaults>
</compile_context>

<pallas_src>
import jax
import jax.numpy as jnp
from jax.experimental import pallas as pl
from jax.experimental.pallas import tpu as pltpu

LANE = 128
SUBLANE = 8


def _round_up(x, m):
    return (x + m - 1) // m * m


def _ceil_div(a, b):
    return -(-a // b)


# ----------------------------------------------------------------------------
# Kernel: layer1 (fused-input dot + combined one-hot dot) -> ReLU ->
#         layer2 -> ReLU -> layer3 -> clamp(0, 100).  Narrow (tb, 4) store.
# ----------------------------------------------------------------------------
def _make_mlp_kernel(d_num, offsets):
    n_cat = len(offsets)

    def kernel(x_ref, w1e_ref, m_ref, b1_ref, w2_ref, b2_ref, w3_ref, b3_ref,
               o_ref):
        tb = x_ref.shape[0]
        k_cat = m_ref.shape[0]

        x = x_ref[...]                                  # [tb, d_num+n_cat] f32
        x_cat = x[:, d_num:].astype(jnp.int32)          # [tb, n_cat]

        # Combined one-hot over ALL categories: one iota, n_cat compares.
        # Segment i occupies columns [offsets[i], offsets[i]+n_i) (static).
        col = jax.lax.broadcasted_iota(jnp.int32, (tb, k_cat), 1)
        oh = (col == (x_cat[:, 0:1] + offsets[0])).astype(jnp.float32)
        for i in range(1, n_cat):                        # static unroll
            oh = oh + (col == (x_cat[:, i:i + 1] + offsets[i])).astype(
                jnp.float32)

        # ---- Layer 1 (Dropout is identity at inference): numeric part (the
        # raw cat-index columns multiply zero rows of w1e) + folded-embedding
        # one-hot part.  bf16 operands, f32 accumulation.
        h = jnp.dot(x.astype(jnp.bfloat16), w1e_ref[...],
                    preferred_element_type=jnp.float32)
        h = h + jnp.dot(oh.astype(jnp.bfloat16), m_ref[...],
                        preferred_element_type=jnp.float32)
        h = jnp.maximum(h + b1_ref[...], 0.0)

        # ---- Layer 2 + ReLU.
        h = jnp.dot(h.astype(jnp.bfloat16), w2_ref[...],
                    preferred_element_type=jnp.float32) + b2_ref[...]
        h = jnp.maximum(h, 0.0)

        # ---- Layer 3 + clamp(0, 100); narrow (tb, 4) store.
        h = jnp.dot(h.astype(jnp.bfloat16), w3_ref[...],
                    preferred_element_type=jnp.float32) + b3_ref[...]
        o_ref[...] = jnp.clip(h, 0.0, 100.0)

    return kernel


# ----------------------------------------------------------------------------
# Wrapper: batch grid, fused input stream, narrow output, weights VMEM-resident.
# ----------------------------------------------------------------------------
def mlp_pallas(x_num, x_cat, kernel_params, meta):
    w1e, m_flat, b1p, w2p, b2p, w3p, b3p = kernel_params
    offsets = meta["offsets"]
    hp = w2p.shape[0]
    k_cat = m_flat.shape[0]
    out_dim = w3p.shape[1]

    B, d_num = x_num.shape
    n_cat = x_cat.shape[1]
    d_cols = d_num + n_cat

    # Single fused input stream (cat indices as f32 columns; exact < 2^24).
    x_in = jnp.concatenate(
        [x_num.astype(jnp.float32), x_cat.astype(jnp.float32)], axis=1)

    # Batch tiling: big sublane-aligned tiles; >=2 tiles whenever the batch
    # allows so the "parallel" axis shards across v7x's two TensorCores.
    cap = 2048
    if B <= 2 * SUBLANE:
        tb = _round_up(B, SUBLANE)
    else:
        n_tiles = max(2, _ceil_div(B, cap))
        tb = min(cap, _round_up(_ceil_div(B, n_tiles), SUBLANE))
    bp = _round_up(B, tb)
    if bp != B:                      # padded rows use cat index 0 (valid)
        x_in = jnp.pad(x_in, ((0, bp - B), (0, 0)))
    grid = (bp // tb,)

    const = lambda i: (0, 0)
    flops = 2 * bp * (d_cols * hp + k_cat * hp + hp * hp + hp * out_dim)
    bytes_accessed = (4 * bp * (d_cols + out_dim)
                      + 2 * (w1e.size + m_flat.size + w2p.size + w3p.size)
                      + 4 * (b1p.size + b2p.size + b3p.size))

    out = pl.pallas_call(
        _make_mlp_kernel(d_num, offsets),
        out_shape=jax.ShapeDtypeStruct((bp, out_dim), jnp.float32),
        grid_spec=pltpu.PrefetchScalarGridSpec(
            num_scalar_prefetch=0,
            grid=grid,
            in_specs=[
                pl.BlockSpec((tb, d_cols), lambda i: (i, 0)),   # fused input
                pl.BlockSpec((d_cols, hp), const),              # W1 extended
                pl.BlockSpec((k_cat, hp), const),               # folded embs
                pl.BlockSpec((1, hp), const),                   # b1
                pl.BlockSpec((hp, hp), const),                  # W2
                pl.BlockSpec((1, hp), const),                   # b2
                pl.BlockSpec((hp, out_dim), const),             # W3 (narrow N)
                pl.BlockSpec((1, out_dim), const),              # b3
            ],
            out_specs=pl.BlockSpec((tb, out_dim), lambda i: (i, 0)),
        ),
        compiler_params=pltpu.CompilerParams(
            dimension_semantics=("parallel",)),
        cost_estimate=pl.CostEstimate(
            flops=flops, transcendentals=0, bytes_accessed=bytes_accessed),
    )(x_in, w1e, m_flat, b1p, w2p, b2p, w3p, b3p)

    return out[:B]


# ----------------------------------------------------------------------------
# Parameters (PyTorch-equivalent shapes) and one-time kernel-param preparation.
# ----------------------------------------------------------------------------
def init_params(key, src_num_dim, n_categories, hidden=50, emb_dim=10,
                out_dim=4):
    """Original-shape params.  Linear weights stored pre-transposed [in, out]."""
    ks = jax.random.split(key, len(n_categories) + 3)
    embs = [jax.random.normal(ks[i], (n, emb_dim), dtype=jnp.float32)
            for i, n in enumerate(n_categories)]
    d_in = src_num_dim + emb_dim * len(n_categories)

    def linear(k, fan_in, fan_out):
        kw, kb = jax.random.split(k)
        bound = 1.0 / (float(fan_in) ** 0.5)
        w = jax.random.uniform(kw, (fan_in, fan_out), jnp.float32, -bound, bound)
        b = jax.random.uniform(kb, (fan_out,), jnp.float32, -bound, bound)
        return w, b

    w1, b1 = linear(ks[-3], d_in, hidden)
    w2, b2 = linear(ks[-2], hidden, hidden)
    w3, b3 = linear(ks[-1], hidden, out_dim)
    return embs, (w1, b1, w2, b2, w3, b3)


def prepare_kernel_params(embs, linear_params, src_num_dim, emb_dim, hidden,
                          out_dim):
    """One-time prep: fold each embedding table through its W1 row-slice,
    stack them tightly along K, zero-pad hidden to lane width, cast matmul
    operands to bf16 (exact transformation up to bf16 rounding)."""
    w1, b1, w2, b2, w3, b3 = linear_params
    n_cat = len(embs)
    hp = _round_up(hidden, LANE)

    sizes = [int(e.shape[0]) for e in embs]
    offsets, off = [], 0
    for s in sizes:
        offsets.append(off)
        off += s
    k_cat = _round_up(off, SUBLANE)

    # Folded embedding matrices E_i @ W1_slice_i, stacked tightly along K.
    m_flat = jnp.zeros((k_cat, hp), jnp.float32)
    for i, e in enumerate(embs):
        sl = w1[src_num_dim + i * emb_dim: src_num_dim + (i + 1) * emb_dim, :]
        m = jnp.dot(e, sl, precision=jax.lax.Precision.HIGHEST)   # [n_i, hidden]
        m_flat = m_flat.at[offsets[i]:offsets[i] + sizes[i], :hidden].set(m)

    # W1 numeric rows, extended with zero rows for the raw cat-index columns.
    w1e = jnp.zeros((src_num_dim + n_cat, hp), jnp.float32)
    w1e = w1e.at[:src_num_dim, :hidden].set(w1[:src_num_dim, :])

    b1p = jnp.zeros((1, hp), jnp.float32).at[0, :hidden].set(b1)
    w2p = jnp.zeros((hp, hp), jnp.float32).at[:hidden, :hidden].set(w2)
    b2p = jnp.zeros((1, hp), jnp.float32).at[0, :hidden].set(b2)
    w3p = jnp.zeros((hp, out_dim), jnp.float32).at[:hidden, :].set(w3)
    b3p = b3.reshape(1, out_dim).astype(jnp.float32)

    params = (w1e.astype(jnp.bfloat16), m_flat.astype(jnp.bfloat16), b1p,
              w2p.astype(jnp.bfloat16), b2p, w3p.astype(jnp.bfloat16), b3p)
    meta = dict(offsets=tuple(offsets))
    return params, meta


def mlp_reference(x_num, x_cat, embs, linear_params):
    """Pure-JAX reference with the ORIGINAL (unpadded, f32) params."""
    w1, b1, w2, b2, w3, b3 = linear_params
    emb_outs = [jnp.take(t, x_cat[:, i], axis=0) for i, t in enumerate(embs)]
    x_all = jnp.concatenate([x_num] + emb_outs, axis=1)
    h = jnp.maximum(jnp.dot(x_all, w1) + b1, 0.0)
    h = jnp.maximum(jnp.dot(h, w2) + b2, 0.0)
    h = jnp.dot(h, w3) + b3
    return jnp.clip(h, 0.0, 100.0)


if __name__ == "__main__":
    key = jax.random.PRNGKey(0)
    k_param, k_num, k_cat = jax.random.split(key, 3)

    src_num_dim = 6
    n_categories = [5, 7, 11]
    emb_dim = 10
    hidden = 50
    out_dim = 4
    batch = 8

    embs, linear_params = init_params(
        k_param, src_num_dim, n_categories,
        hidden=hidden, emb_dim=emb_dim, out_dim=out_dim)
    kernel_params, meta = prepare_kernel_params(
        embs, linear_params, src_num_dim, emb_dim, hidden, out_dim)

    x_num = jax.random.normal(k_num, (batch, src_num_dim), dtype=jnp.float32)
    cat_keys = jax.random.split(k_cat, len(n_categories))
    x_cat = jnp.stack(
        [jax.random.randint(cat_keys[i], (batch,), 0, n)
         for i, n in enumerate(n_categories)], axis=1).astype(jnp.int32)

    forward = jax.jit(lambda xn, xc: mlp_pallas(xn, xc, kernel_params, meta))
    out = forward(x_num, x_cat)
    jax.block_until_ready(out)

    ref = mlp_reference(x_num, x_cat, embs, linear_params)
    assert out.shape == (batch, out_dim)
    assert bool(jnp.all(out >= 0.0)) and bool(jnp.all(out <= 100.0))
    assert bool(jnp.allclose(out, ref, rtol=5e-2, atol=5e-2)), (
        f"max abs err {float(jnp.max(jnp.abs(out - ref)))}")
    print("KERNEL_OK")
</pallas_src>

<mosaic_0001>
module attributes {stable_mosaic.version = 11 : i64} {
  func.func @kernel(%arg0: i32, %arg1: memref<8x9xf32, #tpu.memory_space<vmem>>, %arg2: memref<9x128xbf16, #tpu.memory_space<vmem>>, %arg3: memref<24x128xbf16, #tpu.memory_space<vmem>>, %arg4: memref<1x128xf32, #tpu.memory_space<vmem>>, %arg5: memref<128x128xbf16, #tpu.memory_space<vmem>>, %arg6: memref<1x128xf32, #tpu.memory_space<vmem>>, %arg7: memref<128x4xbf16, #tpu.memory_space<vmem>>, %arg8: memref<1x4xf32, #tpu.memory_space<vmem>>, %arg9: memref<8x4xf32, #tpu.memory_space<vmem>>) attributes {dimension_semantics = [#tpu.dimension_semantics<parallel>], iteration_bounds = array<i64: 1>, scalar_prefetch = 0 : i64, scratch_operands = 0 : i64, tpu.core_type = #tpu.core_type<tc>, window_params = [{transform_indices = @transform_0, window_bounds = array<i64: 8, 9>}, {pipeline_mode = #tpu.pipeline_mode<synchronous>, transform_indices = @transform_1, window_bounds = array<i64: 9, 128>}, {pipeline_mode = #tpu.pipeline_mode<synchronous>, transform_indices = @transform_2, window_bounds = array<i64: 24, 128>}, {pipeline_mode = #tpu.pipeline_mode<synchronous>, transform_indices = @transform_3, window_bounds = array<i64: 1, 128>}, {pipeline_mode = #tpu.pipeline_mode<synchronous>, transform_indices = @transform_4, window_bounds = array<i64: 128, 128>}, {pipeline_mode = #tpu.pipeline_mode<synchronous>, transform_indices = @transform_5, window_bounds = array<i64: 1, 128>}, {pipeline_mode = #tpu.pipeline_mode<synchronous>, transform_indices = @transform_6, window_bounds = array<i64: 128, 4>}, {pipeline_mode = #tpu.pipeline_mode<synchronous>, transform_indices = @transform_7, window_bounds = array<i64: 1, 4>}, {transform_indices = @transform_8, window_bounds = array<i64: 8, 4>}]} {
    %c0 = arith.constant 0 : index
    %c0_0 = arith.constant 0 : index
    %0 = vector.load %arg1[%c0, %c0_0] : memref<8x9xf32, #tpu.memory_space<vmem>>, vector<8x9xf32>
    %1 = vector.extract_strided_slice %0 {offsets = [0, 6], sizes = [8, 3], strides = [1, 1]} : vector<8x9xf32> to vector<8x3xf32>
    %2 = arith.fptosi %1 : vector<8x3xf32> to vector<8x3xi32>
    %3 = tpu.iota {dimensions = array<i32: 1>} : vector<8x24xi32>
    %4 = vector.extract_strided_slice %2 {offsets = [0, 0], sizes = [8, 1], strides = [1, 1]} : vector<8x3xi32> to vector<8x1xi32>
    %c0_i32 = arith.constant 0 : i32
    %5 = vector.broadcast %c0_i32 : i32 to vector<8x1xi32>
    %6 = arith.addi %4, %5 : vector<8x1xi32>
    %7 = vector.broadcast %6 : vector<8x1xi32> to vector<8x24xi32>
    %8 = arith.cmpi eq, %3, %7 : vector<8x24xi32>
    %9 = arith.extui %8 : vector<8x24xi1> to vector<8x24xi32>
    %10 = arith.sitofp %9 : vector<8x24xi32> to vector<8x24xf32>
    %11 = vector.extract_strided_slice %2 {offsets = [0, 1], sizes = [8, 1], strides = [1, 1]} : vector<8x3xi32> to vector<8x1xi32>
    %c5_i32 = arith.constant 5 : i32
    %12 = vector.broadcast %c5_i32 : i32 to vector<8x1xi32>
    %13 = arith.addi %11, %12 : vector<8x1xi32>
    %14 = vector.broadcast %13 : vector<8x1xi32> to vector<8x24xi32>
    %15 = arith.cmpi eq, %3, %14 : vector<8x24xi32>
    %16 = arith.extui %15 : vector<8x24xi1> to vector<8x24xi32>
    %17 = arith.sitofp %16 : vector<8x24xi32> to vector<8x24xf32>
    %18 = arith.addf %10, %17 : vector<8x24xf32>
    %19 = vector.extract_strided_slice %2 {offsets = [0, 2], sizes = [8, 1], strides = [1, 1]} : vector<8x3xi32> to vector<8x1xi32>
    %c12_i32 = arith.constant 12 : i32
    %20 = vector.broadcast %c12_i32 : i32 to vector<8x1xi32>
    %21 = arith.addi %19, %20 : vector<8x1xi32>
    %22 = vector.broadcast %21 : vector<8x1xi32> to vector<8x24xi32>
    %23 = arith.cmpi eq, %3, %22 : vector<8x24xi32>
    %24 = arith.extui %23 : vector<8x24xi1> to vector<8x24xi32>
    %25 = arith.sitofp %24 : vector<8x24xi32> to vector<8x24xf32>
    %26 = arith.addf %18, %25 : vector<8x24xf32>
    %27 = arith.truncf %0 : vector<8x9xf32> to vector<8x9xbf16>
    %c0_1 = arith.constant 0 : index
    %c0_2 = arith.constant 0 : index
    %28 = vector.load %arg2[%c0_1, %c0_2] : memref<9x128xbf16, #tpu.memory_space<vmem>>, vector<9x128xbf16>
    %cst = arith.constant dense<0.000000e+00> : vector<8x128xf32>
    %29 = tpu.matmul %27, %28, %cst {dimension_numbers = #tpu.dot_dimension_numbers<[1], [0], [0], [1], [0, 0, 1, 1], [], []>} : vector<8x9xbf16>, vector<9x128xbf16>, vector<8x128xf32> -> vector<8x128xf32>
    %30 = arith.truncf %26 : vector<8x24xf32> to vector<8x24xbf16>
    %c0_3 = arith.constant 0 : index
    %c0_4 = arith.constant 0 : index
    %31 = vector.load %arg3[%c0_3, %c0_4] : memref<24x128xbf16, #tpu.memory_space<vmem>>, vector<24x128xbf16>
    %cst_5 = arith.constant dense<0.000000e+00> : vector<8x128xf32>
    %32 = tpu.matmul %30, %31, %cst_5 {dimension_numbers = #tpu.dot_dimension_numbers<[1], [0], [0], [1], [0, 0, 1, 1], [], []>} : vector<8x24xbf16>, vector<24x128xbf16>, vector<8x128xf32> -> vector<8x128xf32>
    %33 = arith.addf %29, %32 : vector<8x128xf32>
    %c0_6 = arith.constant 0 : index
    %c0_7 = arith.constant 0 : index
    %34 = vector.load %arg4[%c0_6, %c0_7] : memref<1x128xf32, #tpu.memory_space<vmem>>, vector<1x128xf32>
    %35 = vector.broadcast %34 : vector<1x128xf32> to vector<8x128xf32>
    %36 = arith.addf %33, %35 : vector<8x128xf32>
    %cst_8 = arith.constant 0.000000e+00 : f32
    %37 = vector.broadcast %cst_8 : f32 to vector<8x128xf32>
    %38 = arith.maximumf %36, %37 : vector<8x128xf32>
    %39 = arith.truncf %38 : vector<8x128xf32> to vector<8x128xbf16>
    %c0_9 = arith.constant 0 : index
    %c0_10 = arith.constant 0 : index
    %40 = vector.load %arg5[%c0_9, %c0_10] : memref<128x128xbf16, #tpu.memory_space<vmem>>, vector<128x128xbf16>
    %cst_11 = arith.constant dense<0.000000e+00> : vector<8x128xf32>
    %41 = tpu.matmul %39, %40, %cst_11 {dimension_numbers = #tpu.dot_dimension_numbers<[1], [0], [0], [1], [0, 0, 1, 1], [], []>} : vector<8x128xbf16>, vector<128x128xbf16>, vector<8x128xf32> -> vector<8x128xf32>
    %c0_12 = arith.constant 0 : index
    %c0_13 = arith.constant 0 : index
    %42 = vector.load %arg6[%c0_12, %c0_13] : memref<1x128xf32, #tpu.memory_space<vmem>>, vector<1x128xf32>
    %43 = vector.broadcast %42 : vector<1x128xf32> to vector<8x128xf32>
    %44 = arith.addf %41, %43 : vector<8x128xf32>
    %cst_14 = arith.constant 0.000000e+00 : f32
    %45 = vector.broadcast %cst_14 : f32 to vector<8x128xf32>
    %46 = arith.maximumf %44, %45 : vector<8x128xf32>
    %47 = arith.truncf %46 : vector<8x128xf32> to vector<8x128xbf16>
    %c0_15 = arith.constant 0 : index
    %c0_16 = arith.constant 0 : index
    %48 = vector.load %arg7[%c0_15, %c0_16] : memref<128x4xbf16, #tpu.memory_space<vmem>>, vector<128x4xbf16>
    %cst_17 = arith.constant dense<0.000000e+00> : vector<8x4xf32>
    %49 = tpu.matmul %47, %48, %cst_17 {dimension_numbers = #tpu.dot_dimension_numbers<[1], [0], [0], [1], [0, 0, 1, 1], [], []>} : vector<8x128xbf16>, vector<128x4xbf16>, vector<8x4xf32> -> vector<8x4xf32>
    %c0_18 = arith.constant 0 : index
    %c0_19 = arith.constant 0 : index
    %50 = vector.load %arg8[%c0_18, %c0_19] : memref<1x4xf32, #tpu.memory_space<vmem>>, vector<1x4xf32>
    %51 = vector.broadcast %50 : vector<1x4xf32> to vector<8x4xf32>
    %52 = arith.addf %49, %51 : vector<8x4xf32>
    %cst_20 = arith.constant 0.000000e+00 : f32
    %cst_21 = arith.constant 1.000000e+02 : f32
    %53 = vector.broadcast %cst_20 : f32 to vector<8x4xf32>
    %54 = arith.maximumf %53, %52 : vector<8x4xf32>
    %55 = vector.broadcast %cst_21 : f32 to vector<8x4xf32>
    %56 = arith.minimumf %55, %54 : vector<8x4xf32>
    %c0_22 = arith.constant 0 : index
    %c0_23 = arith.constant 0 : index
    %57 = vector.load %arg9[%c0_22, %c0_23] : memref<8x4xf32, #tpu.memory_space<vmem>>, vector<8x4xf32>
    tpu.vector_store %arg9[%c0_22, %c0_23], %56 {strides = array<i32>} : memref<8x4xf32, #tpu.memory_space<vmem>>, vector<8x4xf32>,
    return
  }
  func.func @transform_0(%arg0: i32) -> (i32, i32) {
    %c0_i32 = arith.constant 0 : i32
    %c0_i32_0 = arith.constant 0 : i32
    return %arg0, %c0_i32 : i32, i32
  }
  func.func @transform_1(%arg0: i32) -> (i32, i32) {
    %c0_i32 = arith.constant 0 : i32
    %c0_i32_0 = arith.constant 0 : i32
    %c0_i32_1 = arith.constant 0 : i32
    return %c0_i32, %c0_i32_0 : i32, i32
  }
  func.func @transform_2(%arg0: i32) -> (i32, i32) {
    %c0_i32 = arith.constant 0 : i32
    %c0_i32_0 = arith.constant 0 : i32
    %c0_i32_1 = arith.constant 0 : i32
    return %c0_i32, %c0_i32_0 : i32, i32
  }
  func.func @transform_3(%arg0: i32) -> (i32, i32) {
    %c0_i32 = arith.constant 0 : i32
    %c0_i32_0 = arith.constant 0 : i32
    %c0_i32_1 = arith.constant 0 : i32
    return %c0_i32, %c0_i32_0 : i32, i32
  }
  func.func @transform_4(%arg0: i32) -> (i32, i32) {
    %c0_i32 = arith.constant 0 : i32
    %c0_i32_0 = arith.constant 0 : i32
    %c0_i32_1 = arith.constant 0 : i32
    return %c0_i32, %c0_i32_0 : i32, i32
  }
  func.func @transform_5(%arg0: i32) -> (i32, i32) {
    %c0_i32 = arith.constant 0 : i32
    %c0_i32_0 = arith.constant 0 : i32
    %c0_i32_1 = arith.constant 0 : i32
    return %c0_i32, %c0_i32_0 : i32, i32
  }
  func.func @transform_6(%arg0: i32) -> (i32, i32) {
    %c0_i32 = arith.constant 0 : i32
    %c0_i32_0 = arith.constant 0 : i32
    %c0_i32_1 = arith.constant 0 : i32
    return %c0_i32, %c0_i32_0 : i32, i32
  }
  func.func @transform_7(%arg0: i32) -> (i32, i32) {
    %c0_i32 = arith.constant 0 : i32
    %c0_i32_0 = arith.constant 0 : i32
    %c0_i32_1 = arith.constant 0 : i32
    return %c0_i32, %c0_i32_0 : i32, i32
  }
  func.func @transform_8(%arg0: i32) -> (i32, i32) {
    %c0_i32 = arith.constant 0 : i32
    %c0_i32_0 = arith.constant 0 : i32
    return %arg0, %c0_i32 : i32, i32
  }
}

</mosaic_0001>

<bundles_post_ra>
// kernel: _lambda_.1
= control target key start
LH: loop header
LB: loop body
LE: loop exit
PB: predicated region body
PF: predicated region fallthrough
CT: control target
= control target key end

     0   :  { %13 = vsyncpa [#allocation3], 0  ;;  %s589_s0 = inlined_call_operand.vmem [shape: f32[8,9], index: 0, kind: input, shape index: {}]   ;;  %s590_s1 = inlined_call_operand.vmem [shape: bf16[9,128], index: 1, kind: input, shape index: {}]   ;;  %s591_s2 = inlined_call_operand.vmem [shape: bf16[24,128], index: 2, kind: input, shape index: {}]   ;;  %s592_s3 = inlined_call_operand.vmem [shape: f32[1,128], index: 3, kind: input, shape index: {}]   ;;  %s593_s4 = inlined_call_operand.hbm [shape: bf16[128,128], index: 4, kind: input, shape index: {}]   ;;  %s594_s5 = inlined_call_operand.vmem [shape: f32[1,128], index: 5, kind: input, shape index: {}]   ;;  %s595_s6 = inlined_call_operand.hbm [shape: bf16[128,4], index: 6, kind: input, shape index: {}]   ;;  %s596_s7 = inlined_call_operand.vmem [shape: f32[1,4], index: 7, kind: input, shape index: {}]   ;;  %s597_s8 = inlined_call_operand.vmem [shape: f32[8,4], index: 8, kind: output, shape index: {}]  }
   0x1   :  { %s27_s29 = sshll.u32 %s593_s4, 4  ;;  %s28_s29 = int_to_ptr.hbm [resolvable:$true] %s27_s29 }
   0x2   :  { %14 = vsyncpa [#allocation5], 0  ;;  %s502_s30 = smov [#allocation2]   ;;  %s42_s12 = sshll.u32 %s595_s6, 4  ;;  %s43_s12 = int_to_ptr.hbm [resolvable:$true] %s42_s12 }
   0x3   :  { %s29_s9 = sshll.u32 %s502_s30, 4  ;;  %s503_s13 = smov 64   ;;  %s30_s9 = int_to_ptr.vmem [resolvable:$true] %s29_s9 }
   0x4   :  { %s504_s14 = smov 4   ;;  %s505_s15 = smov [#allocation4]  }
   0x5   :  { %35 = dma.hbm_to_vmem [thread:$0]  %s28_s29, 1024, %s30_s9, [#allocation3], %s503_s13, %s503_s13, %s504_s14  }
   0x6   :  { %s44_s16 = sshll.u32 %s505_s15, 4  ;;  %s45_s16 = int_to_ptr.vmem [resolvable:$true] %s44_s16 }
   0x7   :  { %50 = dma.hbm_to_vmem [thread:$0]  %s43_s12, 1024, %s45_s16, [#allocation5], %s503_s13, %s503_s13, %s504_s14  }
   0x8   :  { %498 = dma.done.wait [#allocation3], 1024  }
   0x9   :  { %499 = vsyncadd [#allocation3], 4294966272 }
   0xa   :  { %500 = dma.done.wait [#allocation5], 1024  }
   0xb   :  { %501 = vsyncadd [#allocation5], 4294966272  ;;  %v506_v0 = vmov 6   ;;  %v507_v1 = vmov 8   ;;  %v62_v2 = vld [vmem:[%s589_s0] sm:$0xff]  ;;  %v508_v9 = vmov 7   ;;  %v64_v27 = vlaneseq }
   0xc   :  { %443 = vset.pattern.permute.xlu0 %v506_v0  ;;  %445 = vset.pattern.permute.xlu1 %v507_v1  ;;  %vm429_vm0 = vcmp.lt.s32.totalorder %v62_v2, 0  ;;  %v430_v3 = vceil.f32 %v62_v2  ;;  %v431_v4 = vfloor.f32 %v62_v2  ;;  %v344_v10 = vld [vmem:[%s590_s1] sm:$0xf]  ;;  %v411_v11 = vld [vmem:[%s590_s1] sm:$0x10]  ;;  %vm108_vm1 = vcmask 1043456  }
   0xd   :  { %vm134_vm2 = vcmask 1044480   ;;  %v345_v12 = vor.u32 %v411_v11, %v344_v10  ;;  %v509_v13 = vmov 65535   ;;  %v94_v16 = vld [vmem:[%s591_s2 + $0x8] sm:$0xf]  ;;  %v88_v19 = vpack.c.bf16 %v62_v2, %v62_v2  ;;  %v412_v22 = vld [vmem:[%s591_s2] sm:$0xff]  ;;  %v420_v23 = vld [vmem:[#allocation2 + $0x38] sm:$0xff] }
   0xe   :  { %v432_v5 = vsel %vm429_vm0, %v430_v3, %v431_v4  ;;  %v135_v14 = vsel %vm108_vm1, 4294967295, %v509_v13  ;;  %v100_v18 = vunpack.c.l.b16 %v94_v16  ;;  %vm130_vm3 = vcmask 72704   ;;  %228 = vmatpush.bf16.msra.mxu2 %v420_v23  ;;  %v419_v24 = vld [vmem:[#allocation2 + $0x30] sm:$0xff]  ;;  %v418_v25 = vld [vmem:[#allocation2 + $0x28] sm:$0xff]  ;;  %v417_v26 = vld [vmem:[#allocation2 + $0x20] sm:$0xff] }
   0xf   :  { %v433_v6 = vcvt.f32.s32 %v432_v5  ;;  %v136_v15 = vsel %vm134_vm2, %v135_v14, 0  ;;  %v65_v29 = vand.u32 127, %v64_v27  ;;  %v510_v32 = vmov 0.0   ;;  %v416_v39 = vld [vmem:[#allocation2 + $0x18] sm:$0xff]  ;;  %v415_v40 = vld [vmem:[#allocation2 + $0x10] sm:$0xff]  ;;  %v414_v42 = vld [vmem:[#allocation2 + $0x8] sm:$0xff] }
  0x10   :  { %v138_v17 = vand.u32 %v345_v12, %v136_v15  ;;  %v102_v20 = vpack.c.b16 %v100_v18, %v100_v18  ;;  %vm104_vm7 = vcmask 195584   ;;  %v413_v44 = vld [vmem:[#allocation2] sm:$0xff]  ;;  %v428_v45 = vld [vmem:[#allocation4 + $0x38] sm:$0xff]  ;;  %v427_v46 = vld [vmem:[#allocation4 + $0x30] sm:$0xff]  ;;  %vm326_vm8 = vcmask 31744  }
  0x11   :  { %67 = vperm.xlu0 %443, %v433_v6   ;;  %v80_v7 = vadd.s32 12, %v433_v6  ;;  %v72_v8 = vadd.s32 5, %v433_v6  ;;  %311 = vmatpush.bf16.msra.mxu3 %v428_v45  ;;  %v426_v47 = vld [vmem:[#allocation4 + $0x28] sm:$0xff]  ;;  %v425_v48 = vld [vmem:[#allocation4 + $0x20] sm:$0xff]  ;;  %v424_v49 = vld [vmem:[#allocation4 + $0x18] sm:$0xff] }
  0x12   :  { %147 = vmatpush.bf16.msra.mxu1 %v138_v17  ;;  %v110_v21 = vsel %vm108_vm1, %v102_v20, 0  ;;  %229 = vmatpush.bf16.msra.mxu2 %v419_v24  ;;  %v423_v50 = vld [vmem:[#allocation4 + $0x10] sm:$0xff]  ;;  %v447_v51 = vld [vmem:[%s592_s3] ss:$0 sm:$0xff]  ;;  %v422_v58 = vld [vmem:[#allocation4 + $0x8] sm:$0xff] }
  0x13   :  { %82 = vperm.xlu1 %445, %v80_v7   ;;  %118 = vmatpush.bf16.msra.mxu0 %v110_v21  ;;  %v421_v59 = vld [vmem:[#allocation4] sm:$0xff] }
  0x14   :  { %v448_v60 = vld [vmem:[%s594_s5] ss:$0 sm:$0xff] }
  0x15   :  { %346 = vmatmul.msk.bf16.vlgmr.msra.gmra.mxu1 %vm130_vm3, %v88_v19  ;;  %312 = vmatpush.bf16.msra.mxu3 %v427_v46  ;;  %v449_v2 = vld [vmem:[%s596_s7] ss:$0 sm:$0xff] }
  0x16   :  { %230 = vmatpush.bf16.msra.mxu2 %v418_v25 }
  0x17   :  { %119 = vmatpush.bf16.msra.mxu0 %v412_v22 }
  0x19   :  { %444 = vset.pattern.permute.xlu0 %v508_v9  ;;  %313 = vmatpush.bf16.msra.mxu3 %v426_v47 }
  0x1a   :  { %74 = vperm.xlu0 %444, %v72_v8   ;;  %231 = vmatpush.bf16.msra.mxu2 %v417_v26 }
  0x1d   :  { %314 = vmatpush.bf16.msra.mxu3 %v425_v48 }
  0x1e   :  { %232 = vmatpush.bf16.msra.mxu2 %v416_v39 }
  0x21   :  { %315 = vmatpush.bf16.msra.mxu3 %v424_v49 }
  0x22   :  { %446 = vset.pattern.permute.xlu0 %v507_v1  ;;  %233 = vmatpush.bf16.msra.mxu2 %v415_v40 }
  0x25   :  { %316 = vmatpush.bf16.msra.mxu3 %v423_v50 }
  0x26   :  { %234 = vmatpush.bf16.msra.mxu2 %v414_v42 }
  0x29   :  { %317 = vmatpush.bf16.msra.mxu3 %v422_v58 }
  0x2a   :  { %235 = vmatpush.bf16.msra.mxu2 %v413_v44 }
  0x2d   :  { %318 = vmatpush.bf16.msra.mxu3 %v421_v59 }
  0x83   :  { %v68_v28 = vpop.permute.xlu0 %67 }
  0x84   :  { %vm69_vm4 = vcmp.eq.s32.totalorder %v65_v29, %v68_v28 }
  0x85   :  { %v83_v30 = vpop.permute.xlu1 %82  ;;  %v334_v33 = vsel %vm69_vm4, 1.0, %v510_v32 }
  0x86   :  { %vm84_vm5 = vcmp.eq.s32.totalorder %v65_v29, %v83_v30 }
  0x87   :  { %v336_v35 = vsel %vm84_vm5, 1.0, %v510_v32 }
  0x8c   :  { %v75_v31 = vpop.permute.xlu0 %74 }
  0x8d   :  { %vm76_vm6 = vcmp.eq.s32.totalorder %v65_v29, %v75_v31 }
  0x8e   :  { %v335_v34 = vsel %vm76_vm6, 1.0, %v510_v32 }
  0x8f   :  { %v79_v36 = vadd.f32 %v335_v34, %v334_v33 }
  0x91   :  { %v87_v37 = vadd.f32 %v336_v35, %v79_v36 }
  0x92   :  { %v149_v41 = vpop.f32.mrf.mxu1 }
  0x93   :  { %v91_v38 = vpack.c.bf16 %v87_v37, %v87_v37 }
  0x95   :  { %341 = vmatmul.msk.bf16.vlgmr.msra.gmra.mxu0 %vm104_vm7, %v91_v38 }
  0x9a   :  { %v151_v43 = vpop.f32.mrf.mxu1 }
 0x112   :  { %v121_v52 = vpop.f32.mrf.mxu0 }
 0x113   :  { %v150_v53 = vadd.f32 %v149_v41, %v121_v52 }
 0x115   :  { %v157_v54 = vadd.f32 %v447_v51, %v150_v53 }
 0x117   :  { %v158_v55 = vmax.f32 %v157_v54, 0.0 }
 0x119   :  { %v159_v56 = vpack.c.bf16 %v158_v55, %v158_v55 }
 0x11a   :  { %v123_v57 = vpop.f32.mrf.mxu0 }
 0x11b   :  { %236 = vmatmul.bf16.vlgmr.msra.gmra.mxu2 %v159_v56 }
 0x19e   :  { %v237_v61 = vpop.f32.mrf.mxu2 }
 0x19f   :  { %v238_v62 = vadd.f32 %v448_v60, %v237_v61 }
 0x1a1   :  { %v241_v63 = vmax.f32 %v238_v62, 0.0 }
 0x1a3   :  { %v242_v0 = vpack.c.bf16 %v241_v63, %v241_v63 }
 0x1a5   :  { %319 = vmatmul.bf16.vlgmr.msra.gmra.mxu3 %v242_v0 }
 0x1a6   :  { %v239_v1 = vpop.f32.mrf.mxu2 }
 0x228   :  { %v320_v3 = vpop.f32.mrf.mxu3 }
 0x229   :  { %v321_v4 = vadd.f32 %v449_v2, %v320_v3 }
 0x22b   :  { %v324_v5 = vmax.f32 %v321_v4, 0.0 }
 0x22d   :  { %v325_v6 = vmin.f32 %v324_v5, 100.0 }
 0x22f   :  { %327 = vst.msk [vmem:[%s597_s8] sm:$0xff] %vm326_vm8, %v325_v6 }
 0x230   :  { %v322_v7 = vpop.f32.mrf.mxu3 }
 0x231   :  { %332 = vsyncpa [#allocation3], 1 }
 0x232   :  { %333 = vsyncpa [#allocation5], 1 }

</bundles_post_ra>
